<compile_context>
chip_gen: v7x
topology: tpu7x:2x2x1
jax: 0.10.0
libtpu: 0.0.40
codegen_flags: <defaults>
</compile_context>

<pallas_src>
import jax
import jax.numpy as jnp
from jax.experimental import pallas as pl
from jax.experimental.pallas import tpu as pltpu


def _round_up(x: int, m: int) -> int:
    return ((x + m - 1) // m) * m


def _linear_kernel_direct(x_ref, w_ref, b_ref, o_ref):
    """float32 output: accumulate directly into the K-resident output block."""
    k = pl.program_id(2)

    @pl.when(k == 0)
    def _():
        o_ref[...] = jnp.zeros_like(o_ref)

    # x tile [tm, tk] @ w^T tile [tk, tn]  -> MXU-native, f32 accumulation.
    o_ref[...] += jnp.dot(x_ref[...], w_ref[...],
                          preferred_element_type=jnp.float32)

    @pl.when(k == pl.num_programs(2) - 1)
    def _():
        o_ref[...] += b_ref[...]


def _linear_kernel_acc(x_ref, w_ref, b_ref, o_ref, acc_ref):
    """Low-precision output: f32 VMEM accumulator, bias + cast on the last K step."""
    k = pl.program_id(2)

    @pl.when(k == 0)
    def _():
        acc_ref[...] = jnp.zeros_like(acc_ref)

    acc_ref[...] += jnp.dot(x_ref[...], w_ref[...],
                            preferred_element_type=jnp.float32)

    @pl.when(k == pl.num_programs(2) - 1)
    def _():
        o_ref[...] = (acc_ref[...] + b_ref[...]).astype(o_ref.dtype)


_TINY_FALLBACK_THRESHOLD = 1 << 21  # B * D_in * D_out below this -> plain XLA


def unable_relu_forward(x, weight, bias, *, tm=512, tn=512, tk=1024,
                        force_pallas=False):
    """y = x @ weight.T + bias   (== nn.Linear(D_in, D_out).forward)

    x:      [B, D_in]
    weight: [D_out, D_in]   (PyTorch nn.Linear layout)
    bias:   [D_out]
    returns [B, D_out]
    """
    B, D_in = x.shape
    D_out, D_in_w = weight.shape
    assert D_in_w == D_in, "weight/input feature mismatch"
    assert bias.shape == (D_out,)

    # Tiny problems: pallas_call fixed pipeline/grid overhead dominates -> plain XLA.
    if not force_pallas and B * D_in * D_out < _TINY_FALLBACK_THRESHOLD:
        return x @ weight.T + bias

    # Pre-transpose weight once to [D_in, D_out] (static parameter; one HBM pass,
    # amortized over all M blocks and across calls) so the RHS tile arrives MXU-native
    # (N on lanes, K contracted on the leading axis).
    w_t = weight.T

    # --- tile adaptation: block dims are either a multiple of (8, 128) or the full
    # --- array dim (both are legal TPU block shapes).
    tm = tm if B > tm else B
    tn = tn if D_out > tn else D_out
    tk = tk if D_in > tk else D_in

    gm = pl.cdiv(B, tm)
    gn = pl.cdiv(D_out, tn)
    # Megacore: v7x shards the "parallel" grid axes over 2 TensorCores; make sure the
    # parallel grid has >= 2 blocks whenever the problem is big enough to split.
    if gm * gn == 1:
        if B >= 16:
            tm = _round_up(-(-B // 2), 8)
        elif D_out >= 256:
            tn = _round_up(-(-D_out // 2), 128)
        gm = pl.cdiv(B, tm)
        gn = pl.cdiv(D_out, tn)

    # K must be exactly covered by zero-filled blocks (garbage in a partial K block
    # would corrupt the accumulation). M/N partial blocks need no padding: their OOB
    # garbage only reaches output rows/cols that are never stored.
    Kp = _round_up(D_in, tk)
    if Kp != D_in:
        x = jnp.pad(x, ((0, 0), (0, Kp - D_in)))
        w_t = jnp.pad(w_t, ((0, Kp - D_in), (0, 0)))
    gk = Kp // tk

    b2d = bias.reshape(1, D_out)

    out_dtype = x.dtype
    direct = (out_dtype == jnp.float32)
    kernel = _linear_kernel_direct if direct else _linear_kernel_acc
    scratch = [] if direct else [pltpu.VMEM((tm, tn), jnp.float32)]

    return pl.pallas_call(
        kernel,
        out_shape=jax.ShapeDtypeStruct((B, D_out), out_dtype),
        grid=(gm, gn, gk),
        in_specs=[
            pl.BlockSpec((tm, tk), lambda i, j, k: (i, k)),   # x tile
            pl.BlockSpec((tk, tn), lambda i, j, k: (k, j)),   # weight^T tile
            pl.BlockSpec((1, tn), lambda i, j, k: (0, j)),    # bias tile (K-invariant)
        ],
        out_specs=pl.BlockSpec((tm, tn), lambda i, j, k: (i, j)),
        scratch_shapes=scratch,
        compiler_params=pltpu.CompilerParams(
            dimension_semantics=("parallel", "parallel", "arbitrary"),
            vmem_limit_bytes=48 * 1024 * 1024,
        ),
    )(x, w_t, b2d)


if __name__ == "__main__":
    key = jax.random.PRNGKey(0)
    k1, k2, k3, k4, k5, k6 = jax.random.split(key, 6)

    # --- 1) tiny shape matching the module spec: UnableRelu(D_in=32, H=16, D_out=16)
    #        (goes through the plain-XLA tiny-shape fallback).
    B0, D_in0, D_out0 = 8, 32, 16
    bound0 = 1.0 / (D_in0 ** 0.5)
    x0 = jax.random.normal(k1, (B0, D_in0), dtype=jnp.float32)
    w0 = jax.random.uniform(k2, (D_out0, D_in0), minval=-bound0, maxval=bound0,
                            dtype=jnp.float32)
    b0 = jax.random.uniform(k3, (D_out0,), minval=-bound0, maxval=bound0,
                            dtype=jnp.float32)
    y0 = unable_relu_forward(x0, w0, b0)
    jax.block_until_ready(y0)
    assert y0.shape == (B0, D_out0), f"bad shape {y0.shape}"
    assert jnp.allclose(y0, x0 @ w0.T + b0, atol=1e-5, rtol=1e-5), "tiny-shape mismatch"

    # --- 2) small-but-real shape that exercises the Pallas kernel path:
    #        non-multiple-of-8 batch -> partial last M block + megacore split,
    #        lane-dense D_out, single-K-step reduction.
    B1, D_in1, D_out1 = 200, 256, 128
    bound1 = 1.0 / (D_in1 ** 0.5)
    x1 = jax.random.normal(k4, (B1, D_in1), dtype=jnp.float32)
    w1 = jax.random.uniform(k5, (D_out1, D_in1), minval=-bound1, maxval=bound1,
                            dtype=jnp.float32)
    b1 = jax.random.uniform(k6, (D_out1,), minval=-bound1, maxval=bound1,
                            dtype=jnp.float32)
    y1 = unable_relu_forward(x1, w1, b1)          # Pallas path (above fallback threshold)
    jax.block_until_ready(y1)
    y1_ref = x1 @ w1.T + b1
    assert y1.shape == (B1, D_out1), f"bad shape {y1.shape}"
    assert jnp.allclose(y1, y1_ref, atol=2e-4, rtol=2e-4), "pallas-path mismatch"

    print("KERNEL_OK")
</pallas_src>

<mosaic_0001>
module attributes {stable_mosaic.version = 11 : i64} {
  func.func @_linear_kernel_direct(%arg0: i32, %arg1: i32, %arg2: i32, %arg3: memref<104x256xf32, #tpu.memory_space<vmem>>, %arg4: memref<256x128xf32, #tpu.memory_space<vmem>>, %arg5: memref<1x128xf32, #tpu.memory_space<vmem>>, %arg6: memref<104x128xf32, #tpu.memory_space<vmem>>) attributes {dimension_semantics = [#tpu.dimension_semantics<parallel>, #tpu.dimension_semantics<parallel>, #tpu.dimension_semantics<arbitrary>], iteration_bounds = array<i64: 2, 1, 1>, scalar_prefetch = 0 : i64, scratch_operands = 0 : i64, tpu.core_type = #tpu.core_type<tc>, window_params = [{transform_indices = @transform_0, window_bounds = array<i64: 104, 256>}, {transform_indices = @transform_1, window_bounds = array<i64: 256, 128>}, {transform_indices = @transform_2, window_bounds = array<i64: 1, 128>}, {transform_indices = @transform_3, window_bounds = array<i64: 104, 128>}]} {
    %c0_i32 = arith.constant 0 : i32
    %0 = arith.cmpi eq, %arg2, %c0_i32 : i32
    %1 = arith.extui %0 : i1 to i32
    %c0_i32_0 = arith.constant 0 : i32
    %2 = arith.cmpi ne, %1, %c0_i32_0 : i32
    scf.if %2 {
      %cst_10 = arith.constant 0.000000e+00 : f32
      %12 = vector.broadcast %cst_10 : f32 to vector<104x128xf32>
      %c0_11 = arith.constant 0 : index
      %c0_12 = arith.constant 0 : index
      %13 = vector.load %arg6[%c0_11, %c0_12] : memref<104x128xf32, #tpu.memory_space<vmem>>, vector<104x128xf32>
      tpu.vector_store %arg6[%c0_11, %c0_12], %12 {strides = array<i32>} : memref<104x128xf32, #tpu.memory_space<vmem>>, vector<104x128xf32>,
    } else {
    }
    %c0 = arith.constant 0 : index
    %c0_1 = arith.constant 0 : index
    %3 = vector.load %arg6[%c0, %c0_1] : memref<104x128xf32, #tpu.memory_space<vmem>>, vector<104x128xf32>
    %c0_2 = arith.constant 0 : index
    %c0_3 = arith.constant 0 : index
    %4 = vector.load %arg3[%c0_2, %c0_3] : memref<104x256xf32, #tpu.memory_space<vmem>>, vector<104x256xf32>
    %c0_4 = arith.constant 0 : index
    %c0_5 = arith.constant 0 : index
    %5 = vector.load %arg4[%c0_4, %c0_5] : memref<256x128xf32, #tpu.memory_space<vmem>>, vector<256x128xf32>
    %cst = arith.constant dense<0.000000e+00> : vector<104x128xf32>
    %6 = tpu.matmul %4, %5, %cst {dimension_numbers = #tpu.dot_dimension_numbers<[1], [0], [0], [1], [0, 0, 1, 1], [], []>} : vector<104x256xf32>, vector<256x128xf32>, vector<104x128xf32> -> vector<104x128xf32>
    %7 = arith.addf %3, %6 : vector<104x128xf32>
    %c0_6 = arith.constant 0 : index
    %c0_7 = arith.constant 0 : index
    %8 = vector.load %arg6[%c0_6, %c0_7] : memref<104x128xf32, #tpu.memory_space<vmem>>, vector<104x128xf32>
    tpu.vector_store %arg6[%c0_6, %c0_7], %7 {strides = array<i32>} : memref<104x128xf32, #tpu.memory_space<vmem>>, vector<104x128xf32>,
    %c0_i32_8 = arith.constant 0 : i32
    %9 = arith.cmpi eq, %arg2, %c0_i32_8 : i32
    %10 = arith.extui %9 : i1 to i32
    %c0_i32_9 = arith.constant 0 : i32
    %11 = arith.cmpi ne, %10, %c0_i32_9 : i32
    scf.if %11 {
      %c0_10 = arith.constant 0 : index
      %c0_11 = arith.constant 0 : index
      %12 = vector.load %arg6[%c0_10, %c0_11] : memref<104x128xf32, #tpu.memory_space<vmem>>, vector<104x128xf32>
      %c0_12 = arith.constant 0 : index
      %c0_13 = arith.constant 0 : index
      %13 = vector.load %arg5[%c0_12, %c0_13] : memref<1x128xf32, #tpu.memory_space<vmem>>, vector<1x128xf32>
      %14 = vector.broadcast %13 : vector<1x128xf32> to vector<104x128xf32>
      %15 = arith.addf %12, %14 : vector<104x128xf32>
      %c0_14 = arith.constant 0 : index
      %c0_15 = arith.constant 0 : index
      %16 = vector.load %arg6[%c0_14, %c0_15] : memref<104x128xf32, #tpu.memory_space<vmem>>, vector<104x128xf32>
      tpu.vector_store %arg6[%c0_14, %c0_15], %15 {strides = array<i32>} : memref<104x128xf32, #tpu.memory_space<vmem>>, vector<104x128xf32>,
    } else {
    }
    return
  }
  func.func @transform_0(%arg0: i32, %arg1: i32, %arg2: i32) -> (i32, i32) {
    %c0_i32 = arith.constant 0 : i32
    return %arg0, %arg2 : i32, i32
  }
  func.func @transform_1(%arg0: i32, %arg1: i32, %arg2: i32) -> (i32, i32) {
    %c0_i32 = arith.constant 0 : i32
    return %arg2, %arg1 : i32, i32
  }
  func.func @transform_2(%arg0: i32, %arg1: i32, %arg2: i32) -> (i32, i32) {
    %c0_i32 = arith.constant 0 : i32
    %c0_i32_0 = arith.constant 0 : i32
    return %c0_i32, %arg1 : i32, i32
  }
  func.func @transform_3(%arg0: i32, %arg1: i32, %arg2: i32) -> (i32, i32) {
    %c0_i32 = arith.constant 0 : i32
    return %arg0, %arg1 : i32, i32
  }
}

</mosaic_0001>

<bundles_post_ra>
// kernel: tpu_custom_call.1
= control target key start
LH: loop header
LB: loop body
LE: loop exit
PB: predicated region body
PF: predicated region fallthrough
CT: control target
= control target key end

     0   :  { %8 = vsyncpa [#allocation3], 0  ;;  %s1375_s0 = inlined_call_operand.hbm [shape: f32[200,256], index: 0, kind: input, shape index: {}]   ;;  %s1376_s1 = inlined_call_operand.hbm [shape: f32[256,128], index: 1, kind: input, shape index: {}]   ;;  %s1377_s2 = inlined_call_operand.vmem [shape: f32[1,128], index: 2, kind: input, shape index: {}]   ;;  %s1378_s3 = inlined_call_operand.hbm [shape: f32[200,128], index: 3, kind: output, shape index: {}]  }
   0x1   :  { %10 = vsyncpa [#allocation3 + $0x1], 0 }
   0x2   :  { %11 = vsyncpa [#allocation6], 0 }
   0x3   :  { %12 = vsyncpa [#allocation4], 0 }
   0x4   :  { %14 = vsyncpa [#allocation4 + $0x1], 0  ;;  %s1100_s12 = smov 0   ;;  %s1102_s13 = smov 0  }
   0x5   :  { %s1104_s14 = smov 0   ;;  %s1106_s15 = smov 0  }
   0x6   :  { %s1108_s16 = smov 0   ;;  %s1110_s17 = smov 0  }
   0x7 LB: > { %s704_s18 = sadd.s32 4294967295, %s1069_s17   ;;  %s705_s19 = sadd.s32 4294967294, %s1069_s17   ;;  %s1069_s17 = sphi %s1110_s17, %s20_s17   ;;  %s1065_s16 = sphi %s1108_s16, %s1400_s16   ;;  %s1061_s15 = sphi %s1106_s15, %s1399_s15   ;;  %s1057_s14 = sphi %s1104_s14, %s1398_s14   ;;  %s1053_s13 = sphi %s1102_s13, %s1397_s13   ;;  %s1049_s12 = sphi %s1100_s12, %s1396_s12  }
   0x8   : > { %s39_s20 = sadd.s32 1, %s1065_s16  ;;  %s48_s21 = sadd.s32 1, %s1057_s14 }
   0x9   : > { %p41_p0 = scmp.ge.s32.totalorder %s39_s20, 2  ;;  %p55_p1 = scmp.ne.s32.totalorder %s1057_s14, %s1053_s13 }
   0xa   : > { %p56_p2 = scmp.eq.s32.totalorder %s1069_s17, 0  ;;  %p61_p3 = scmp.ne.s32.totalorder %s1053_s13, %s1049_s12 }
   0xb   : > { %s1402_s20 = smov (%p41_p0, %s39_s20), 0  ;;  %p1145_p5 = scmp.eq.s32.totalorder %s704_s18, 0 }
   0xc   : > { %p1141_p4 = por %p56_p2, %p55_p1  ;;  %s43_s24 = ssub.s32 %s1065_s16, %s1402_s20 }
   0xd   : > { %s1384_s23 = scalar_select %p1145_p5, 1, 0 }
   0xe   : > { %s1383_s22 = scalar_select %p1141_p4, 1, 0 }
   0xf   : > { %p141_p6 = scmp.eq.s32.totalorder %s704_s18, 1  ;;  %p46_p7 = scmp.eq.s32.totalorder %s43_s24, 0 }
  0x10   : > { %p1153_p8 = por %p1145_p5, %p61_p3  ;;  %p147_p10 = scmp.eq.s32.totalorder %s705_s19, 1 }
  0x11   : > { %p1157_p9 = por %p141_p6, %p55_p1  ;;  %p706_p12 = scmp.ge.s32.totalorder %s1069_s17, 1 }
  0x12   : > { %s1385_s25 = scalar_select %p1153_p8, 1, 0 }
  0x13   : > { %s1386_s26 = scalar_select %p1157_p9, 1, 0 }
  0x14   : > { %s1162_s27 = scalar_select %p46_p7, %s1057_s14, %s48_s21  }
  0x15   : > { %p1164_p11 = por %p147_p10, %p61_p3  ;;  %p154_p13 = scmp.lt.s32.totalorder %s1069_s17, 3 }
  0x16   : > { %s1071_s30 = smov [#allocation5]   ;;  %s927_s8 = scalar_lea.hbm %s1376_s1, 4096 }
  0x17   : > { %s1387_s28 = scalar_select %p1164_p11, 1, 0 }
  0x18   : > { %p1170_p0 = pnand %p706_p12, %p154_p13  ;;  %s170_s4 = sshll.u32 %s1071_s30, 4  ;;  %s171_s4 = int_to_ptr.vmem [resolvable:$true] %s170_s4 }
  0x19   : > { %p928_p3 = scmp.ne.s32.totalorder %s1376_s1, %s927_s8  ;;  %p934_p12 = scmp.lt.u32.totalorder %s927_s8, %s1376_s1 }
  0x1a   : > { %s1388_s29 = scalar_select %p1170_p0, 1, 0 }
  0x1b   : > { %p860_p1 = pneg %p1170_p0 }
  0x1d   : > { %p1178_p2 = pnand %p860_p1, %p1145_p5 }
  0x1f   : > { %p929_p6 = pneg %p1178_p2 }
  0x21   : > { %p930_p7 = pnand %p929_p6, %p928_p3 }
  0x23   : > { %p931_p10 = pneg %p930_p7 }
  0x25   : > { %p936_p13 = pnand %p934_p12, %p931_p10 }
  0x27   : > { %939 = shalt.err (!%p936_p13)
}
  0x28   : > { %s940_s19 = scalar_lea.vmem %s171_s4, 4096  ;;  %p948_p5 = scmp.lt.s32.totalorder %s171_s4, %s171_s4 }
  0x29   : > { %p941_p1 = scmp.ne.s32.totalorder %s171_s4, %s940_s19  ;;  %p949_p8 = scmp.lt.s32.totalorder %s940_s19, %s940_s19 }
  0x2b   : > { %p943_p11 = pnand %p941_p1, %p929_p6  ;;  %p950_p0 = por %p949_p8, %p948_p5 }
  0x2d   : > { %p944_p9 = pneg %p943_p11 }
  0x2f   : > { %p951_p4 = pnand %p950_p0, %p944_p9 }
  0x31   : > { %954 = shalt.err (!%p951_p4)
}
  0x32   : > { %s1072_s21 = smov 128   ;;  %s1073_s24 = smov 8  }
  0x33   : > { %863 = dma.hbm_to_vmem [thread:$0]  (!%p1178_p2), %s1376_s1, 4096, %s171_s4, [#allocation6], %s1072_s21, %s1072_s21, %s1073_s24  }
  0x34   : > { %p709_p3 = scmp.ge.s32.totalorder %s1069_s17, 2 }
  0x35   : > { %p1390_p11 = scmp.ne.s32.totalorder (!%p709_p3), %s1383_s22, 0 }
  0x36   : > { %186 = sbr.rel (%p709_p3) target bundleno = 96 (0x60), region = 24 }
  0x3d   : > { %189 = sbr.rel (!%p1390_p11) target bundleno = 96 (0x60), region = 28  ;;  %s190_s7 = sand.u32 (%p1390_p11), 1, %s1057_s14  }
  0x3e   : > { %s195_s8 = smul.u32 (%p1390_p11), 13, %s1065_s16  ;;  %s1208_s11 = scalar_lea.sflag (%p1390_p11), [#allocation3], %s190_s7 }
  0x3f   : > { %s851_s9 = smul.u32 (%p1390_p11), 208, %s190_s7 }
  0x40   : > { %s197_s10 = ssub.s32 (%p1390_p11), 25, %s195_s8 }
  0x41   : > { %p198_p4 = scmp.lt.s32.totalorder (%p1390_p11), %s197_s10, 13  ;;  %s194_s18 = scalar_lea.vmem (%p1390_p11), [#allocation2], %s851_s9 }
  0x44   : > { %s1404_s10 = smov (!%p198_p4, %s197_s10), 13 }
  0x45   : > { %s1205_s5 = sshll.u32 %s1404_s10, 8 }
  0x46   : > { %s203_s4 = ssub.s32 3328, %s1205_s5 }
  0x47   : > { %204 = vsyncadd %s1208_s11, %s203_s4  ;;  %p712_p5 = scmp.ne.s32.totalorder %s1205_s5, 0  ;;  %s731_s22 = smul.u32 3328, %s1065_s16 }
  0x48   : > { %s211_s19 = sshll.u32 %s194_s18, 4  ;;  %s959_s9 = scalar_lea.hbm %s1375_s0, 6400  ;;  %s1218_s19 = int_to_ptr.vmem [resolvable:$true] %s211_s19 }
  0x49   : > { %s1216_s30 = scalar_lea.hbm %s1375_s0, %s731_s22 }
  0x4a   : > { %s955_s6 = scalar_lea.hbm %s1216_s30, %s1205_s5  ;;  %p960_p2 = scmp.lt.u32.totalorder %s1216_s30, %s1375_s0 }
  0x4b   : > { %p956_p8 = scmp.ne.s32.totalorder %s1216_s30, %s955_s6  ;;  %p961_p6 = scmp.lt.u32.totalorder %s959_s9, %s955_s6 }
  0x4c   : > { %p963_p10 = scmp.lt.u32.totalorder %s955_s6, %s1216_s30 }
  0x4d   : > { %p957_p9 = pnand %p956_p8, %p712_p5  ;;  %p962_p7 = por %p961_p6, %p960_p2 }
  0x4f   : > { %p958_p0 = pneg %p957_p9  ;;  %p964_p12 = por %p963_p10, %p962_p7 }
  0x51   : > { %p965_p13 = pnand %p964_p12, %p958_p0 }
  0x53   : > { %968 = shalt.err (!%p965_p13)
}
  0x54   : > { %s969_s18 = scalar_lea.vmem %s1218_s19, %s1205_s5  ;;  %s1074_s22 = smov [#allocation2]  }
  0x55   : > { %p970_p1 = scmp.ne.s32.totalorder %s1218_s19, %s969_s18  ;;  %s973_s21 = sshll.u32 %s1074_s22, 4  ;;  %s974_s21 = int_to_ptr.vmem [resolvable:$false] %s973_s21 }
  0x56   : > { %s975_s24 = scalar_lea.vmem %s974_s21, 6656  ;;  %p976_p8 = scmp.lt.s32.totalorder %s1218_s19, %s974_s21 }
  0x57   : > { %p971_p11 = pnand %p970_p1, %p712_p5  ;;  %p977_p9 = scmp.lt.s32.totalorder %s975_s24, %s969_s18 }
  0x59   : > { %p972_p4 = pneg %p971_p11  ;;  %p978_p2 = por %p977_p9, %p976_p8 }
  0x5b   : > { %p979_p6 = pnand %p978_p2, %p972_p4 }
  0x5d   : > { %982 = shalt.err (!%p979_p6)
}
  0x5e   : > { %s1075_s6 = smov 256   ;;  %s1076_s7 = smov 16  }
  0x5f   : > { %217 = dma.hbm_to_vmem [thread:$0]  (%p712_p5), %s1216_s30, %s1205_s5, %s1218_s19, %s1208_s11, %s1075_s6, %s1075_s6, %s1076_s7  }
  0x60 PF: > { %p1391_p0 = scmp.ne.s32.totalorder %s1388_s29, 0 }
  0x61   : > { %s1248_s8 = sand.u32 (!%p1391_p0), 1, %s1053_s13   ;;  %p1392_p7 = scmp.ne.s32.totalorder (!%p1391_p0), %s1385_s25, 0 }
  0x62   : > { %223 = sbr.rel (%p1391_p0) target bundleno = 414 (0x19e), region = 32  ;;  %s226_s10 = scalar_lea.sflag (!%p1391_p0), [#allocation3], %s1248_s8 }
  0x63   : > { %s852_s9 = smul.u32 (!%p1391_p0), 208, %s1248_s8 }
  0x65   : > { %s1252_s4 = scalar_lea.vmem (!%p1391_p0), [#allocation2], %s852_s9 }
  0x69   : > { %1036 = dma.done.wait (%p1392_p7), %s226_s10, 3328  }
  0x6a   : > { %1038 = vsyncadd (%p1392_p7), %s226_s10, 4294963968  ;;  %p1393_p5 = scmp.ne.s32.totalorder %s1384_s23, 0 }
  0x6c   : > { %1040 = dma.done.wait (%p1393_p5), [#allocation6], 4096  }
  0x6d   : > { %1042 = vsyncadd (%p1393_p5), [#allocation6], 4294963200  ;;  %v347_v0 = vld [vmem:[#allocation5 + $0x80] sm:$0xff]  ;;  %v348_v1 = vld [vmem:[#allocation5 + $0x88] sm:$0xff]  ;;  %s853_s23 = smul.u32 104, %s1248_s8  ;;  %s569_s11 = scalar_lea.sflag [#allocation4], %s1248_s8 }
  0x6e   : > { %v331_v2 = vld [vmem:[#allocation5] sm:$0xff]  ;;  %v803_v3 = vpack.c.bf16 %v348_v1, %v347_v0  ;;  %v332_v4 = vld [vmem:[#allocation5 + $0x8] sm:$0xff]  ;;  %v349_v5 = vld [vmem:[#allocation5 + $0x90] sm:$0xff]  ;;  %p1394_p10 = scmp.ne.s32.totalorder %s1386_s26, 0 }
  0x6f   : > { %v350_v6 = vld [vmem:[#allocation5 + $0x98] sm:$0xff]  ;;  %v805_v7 = vpack.c.bf16 %v332_v4, %v331_v2  ;;  %v333_v9 = vld [vmem:[#allocation5 + $0x10] sm:$0xff]  ;;  %v351_v11 = vld [vmem:[#allocation5 + $0xa0] sm:$0xff]  ;;  %s1292_s5 = scalar_lea.vmem [#allocation7], %s853_s23  ;;  %s576_s19 = smul.u32 (%p1394_p10), 13, %s1061_s15 }
  0x70   : > { %v807_v8 = vpack.c.bf16 %v350_v6, %v349_v5  ;;  %v334_v10 = vld [vmem:[#allocation5 + $0x18] sm:$0xff]  ;;  %804 = vmatprep.subr.bf16.mxu0 %v803_v3  ;;  %835 = vmatprep.subr.bf16.mxu1 %v803_v3  ;;  %v352_v12 = vld [vmem:[#allocation5 + $0xa8] sm:$0xff]  ;;  %v335_v15 = vld [vmem:[#allocation5 + $0x20] sm:$0xff] }
  0x71   : > { %806 = vmatpush3.bf16.msra.mxu0 %v805_v7  ;;  %843 = vmatpush3.bf16.msra.mxu1 %v805_v7  ;;  %v809_v13 = vpack.c.bf16 %v334_v10, %v333_v9  ;;  %v811_v14 = vpack.c.bf16 %v352_v12, %v351_v11  ;;  %v336_v16 = vld [vmem:[#allocation5 + $0x28] sm:$0xff]  ;;  %v353_v17 = vld [vmem:[#allocation5 + $0xb0] sm:$0xff]  ;;  %v354_v18 = vld [vmem:[#allocation5 + $0xb8] sm:$0xff]  ;;  %s577_s30 = ssub.s32 (%p1394_p10), 25, %s576_s19 }
  0x72   : > { %808 = vmatprep.subr.bf16.mxu0 %v807_v8  ;;  %836 = vmatprep.subr.bf16.mxu1 %v807_v8  ;;  %v813_v19 = vpack.c.bf16 %v336_v16, %v335_v15  ;;  %v815_v20 = vpack.c.bf16 %v354_v18, %v353_v17  ;;  %v337_v21 = vld [vmem:[#allocation5 + $0x30] sm:$0xff]  ;;  %v338_v22 = vld [vmem:[#allocation5 + $0x38] sm:$0xff]  ;;  %v355_v23 = vld [vmem:[#allocation5 + $0xc0] sm:$0xff]  ;;  %p578_p12 = scmp.lt.s32.totalorder (%p1394_p10), %s577_s30, 13 }
  0x73   : > { %v356_v24 = vld [vmem:[#allocation5 + $0xc8] sm:$0xff]  ;;  %v817_v27 = vpack.c.bf16 %v338_v22, %v337_v21  ;;  %v339_v29 = vld [vmem:[#allocation5 + $0x40] sm:$0xff]  ;;  %v357_v31 = vld [vmem:[#allocation5 + $0xd0] sm:$0xff] }
  0x74   : > { %v306_v25 = vld [vmem:[%s1252_s4 + $0x8] sm:$0xff]  ;;  %v320_v26 = vld [vmem:[%s1252_s4 + $0x78] sm:$0xff]  ;;  %v819_v28 = vpack.c.bf16 %v356_v24, %v355_v23  ;;  %v341_v35 = vld [vmem:[#allocation5 + $0x50] sm:$0xff] }
  0x75   : > { %810 = vmatpush3.bf16.msra.mxu0 %v809_v13  ;;  %844 = vmatpush3.bf16.msra.mxu1 %v809_v13  ;;  %v340_v30 = vld [vmem:[#allocation5 + $0x48] sm:$0xff]  ;;  %v358_v32 = vld [vmem:[#allocation5 + $0xd8] sm:$0xff]  ;;  %v359_v37 = vld [vmem:[#allocation5 + $0xe0] sm:$0xff] }
  0x76   : > { %812 = vmatprep.subr.bf16.mxu0 %v811_v14  ;;  %837 = vmatprep.subr.bf16.mxu1 %v811_v14  ;;  %v821_v33 = vpack.c.bf16 %v340_v30, %v339_v29  ;;  %v823_v34 = vpack.c.bf16 %v358_v32, %v357_v31  ;;  %v342_v36 = vld [vmem:[#allocation5 + $0x58] sm:$0xff]  ;;  %v360_v38 = vld [vmem:[#allocation5 + $0xe8] sm:$0xff]  ;;  %v343_v41 = vld [vmem:[#allocation5 + $0x60] sm:$0xff] }
  0x77   : > { %427 = vmatprep.mubr.f32.mxu0 %v306_v25  ;;  %462 = vmatprep.mubr.f32.mxu1 %v320_v26  ;;  %v825_v39 = vpack.c.bf16 %v342_v36, %v341_v35  ;;  %v827_v40 = vpack.c.bf16 %v360_v38, %v359_v37  ;;  %v344_v42 = vld [vmem:[#allocation5 + $0x68] sm:$0xff]  ;;  %v361_v43 = vld [vmem:[#allocation5 + $0xf0] sm:$0xff]  ;;  %v362_v44 = vld [vmem:[#allocation5 + $0xf8] sm:$0xff] }
  0x78   : > { %v829_v45 = vpack.c.bf16 %v344_v42, %v343_v41  ;;  %v831_v46 = vpack.c.bf16 %v362_v44, %v361_v43  ;;  %v345_v47 = vld [vmem:[#allocation5 + $0x70] sm:$0xff]  ;;  %v346_v48 = vld [vmem:[#allocation5 + $0x78] sm:$0xff]  ;;  %v719_v16 = vld [vmem:[%s1377_s2] ss:$0 sm:$0xff] }
  0x79   : > { %814 = vmatpush3.bf16.msra.mxu0 %v813_v19  ;;  %845 = vmatpush3.bf16.msra.mxu1 %v813_v19  ;;  %v833_v49 = vpack.c.bf16 %v346_v48, %v345_v47  ;;  %v305_v50 = vld [vmem:[%s1252_s4] sm:$0xff]  ;;  %v319_v51 = vld [vmem:[%s1252_s4 + $0x70] sm:$0xff]  ;;  %v308_v52 = vld [vmem:[%s1252_s4 + $0x18] sm:$0xff] }
  0x7a   : > { %816 = vmatprep.subr.bf16.mxu0 %v815_v20  ;;  %838 = vmatprep.subr.bf16.mxu1 %v815_v20  ;;  %v322_v53 = vld [vmem:[%s1252_s4 + $0x88] sm:$0xff]  ;;  %v307_v54 = vld [vmem:[%s1252_s4 + $0x10] sm:$0xff]  ;;  %v321_v55 = vld [vmem:[%s1252_s4 + $0x80] sm:$0xff] }
  0x7b   : > { %v310_v56 = vld [vmem:[%s1252_s4 + $0x28] sm:$0xff]  ;;  %v324_v57 = vld [vmem:[%s1252_s4 + $0x98] sm:$0xff]  ;;  %v309_v58 = vld [vmem:[%s1252_s4 + $0x20] sm:$0xff] }
  0x7c   : > { %v323_v59 = vld [vmem:[%s1252_s4 + $0x90] sm:$0xff]  ;;  %v312_v60 = vld [vmem:[%s1252_s4 + $0x38] sm:$0xff]  ;;  %v326_v61 = vld [vmem:[%s1252_s4 + $0xa8] sm:$0xff] }
  0x7d   : > { %818 = vmatpush3.bf16.msra.mxu0 %v817_v27  ;;  %846 = vmatpush3.bf16.msra.mxu1 %v817_v27  ;;  %v311_v62 = vld [vmem:[%s1252_s4 + $0x30] sm:$0xff]  ;;  %v325_v63 = vld [vmem:[%s1252_s4 + $0xa0] sm:$0xff]  ;;  %v314_v0 = vld [vmem:[%s1252_s4 + $0x48] sm:$0xff] }
  0x7e   : > { %820 = vmatprep.subr.bf16.mxu0 %v819_v28  ;;  %839 = vmatprep.subr.bf16.mxu1 %v819_v28  ;;  %v328_v1 = vld [vmem:[%s1252_s4 + $0xb8] sm:$0xff]  ;;  %v313_v2 = vld [vmem:[%s1252_s4 + $0x40] sm:$0xff]  ;;  %v327_v3 = vld [vmem:[%s1252_s4 + $0xb0] sm:$0xff] }
  0x7f   : > { %v316_v4 = vld [vmem:[%s1252_s4 + $0x58] sm:$0xff]  ;;  %v330_v5 = vld [vmem:[%s1252_s4 + $0xc8] sm:$0xff]  ;;  %v315_v6 = vld [vmem:[%s1252_s4 + $0x50] sm:$0xff] }
  0x80   : > { %v329_v7 = vld [vmem:[%s1252_s4 + $0xc0] sm:$0xff]  ;;  %v318_v8 = vld [vmem:[%s1252_s4 + $0x68] sm:$0xff] }
  0x81   : > { %822 = vmatpush3.bf16.msra.mxu0 %v821_v33  ;;  %847 = vmatpush3.bf16.msra.mxu1 %v821_v33  ;;  %v317_v9 = vld [vmem:[%s1252_s4 + $0x60] sm:$0xff] }
  0x82   : > { %824 = vmatprep.subr.bf16.mxu0 %v823_v34  ;;  %840 = vmatprep.subr.bf16.mxu1 %v823_v34 }
  0x85   : > { %826 = vmatpush3.bf16.msra.mxu0 %v825_v39  ;;  %848 = vmatpush3.bf16.msra.mxu1 %v825_v39 }
  0x86   : > { %828 = vmatprep.subr.bf16.mxu0 %v827_v40  ;;  %841 = vmatprep.subr.bf16.mxu1 %v827_v40 }
  0x89   : > { %830 = vmatpush3.bf16.msra.mxu0 %v829_v45  ;;  %849 = vmatpush3.bf16.msra.mxu1 %v829_v45 }
  0x8a   : > { %832 = vmatprep.subr.bf16.mxu0 %v831_v46  ;;  %842 = vmatprep.subr.bf16.mxu1 %v831_v46 }
  0x8d   : > { %834 = vmatpush3.bf16.msra.mxu0 %v833_v49  ;;  %850 = vmatpush3.bf16.msra.mxu1 %v833_v49 }
  0x90   : > { %428 = vmatmul.mubr.f32.vlgmr.msra.gmra.mrb[0].mxu0 %v305_v50  ;;  %463 = vmatmul.mubr.f32.vlgmr.msra.gmra.mrb[0].mxu1 %v319_v51 }
  0x91   : > { %432 = vmatprep.mubr.f32.mxu0 %v308_v52  ;;  %467 = vmatprep.mubr.f32.mxu1 %v322_v53 }
  0x94   : > { %433 = vmatmul.mubr.f32.gmra.mrb[2].mxu0 %v307_v54  ;;  %468 = vmatmul.mubr.f32.gmra.mrb[2].mxu1 %v321_v55 }
  0x95   : > { %437 = vmatprep.mubr.f32.mxu0 %v310_v56  ;;  %472 = vmatprep.mubr.f32.mxu1 %v324_v57 }
  0x98   : > { %438 = vmatmul.mubr.f32.gmra.mrb[4].mxu0 %v309_v58  ;;  %473 = vmatmul.mubr.f32.gmra.mrb[4].mxu1 %v323_v59 }
  0x99   : > { %442 = vmatprep.mubr.f32.mxu0 %v312_v60  ;;  %477 = vmatprep.mubr.f32.mxu1 %v326_v61 }
  0x9c   : > { %443 = vmatmul.mubr.f32.gmra.mrb[6].mxu0 %v311_v62  ;;  %478 = vmatmul.mubr.f32.gmra.mrb[6].mxu1 %v325_v63 }
  0x9d   : > { %447 = vmatprep.mubr.f32.mxu0 %v314_v0  ;;  %482 = vmatprep.mubr.f32.mxu1 %v328_v1 }
  0xa0   : > { %448 = vmatmul.mubr.f32.gmra.mrb[8].mxu0 %v313_v2  ;;  %483 = vmatmul.mubr.f32.gmra.mrb[8].mxu1 %v327_v3 }
  0xa1   : > { %452 = vmatprep.mubr.f32.mxu0 %v316_v4  ;;  %487 = vmatprep.mubr.f32.mxu1 %v330_v5 }
  0xa4   : > { %453 = vmatmul.mubr.f32.gmra.mrb[10].mxu0 %v315_v6  ;;  %488 = vmatmul.mubr.f32.gmra.mrb[10].mxu1 %v329_v7 }
  0xa5   : > { %457 = vmatprep.mubr.f32.mxu0 %v318_v8 }
  0xa8   : > { %458 = vmatmul.mubr.f32.gmra.mrb[12].mxu0 %v317_v9 }
 0x163   : > { %v764_v10 = vpop.f32.mrb[0].mxu0  ;;  %v785_v11 = vpop.f32.mrb[0].mxu1 }
 0x164   : > { %v765_v12 = vpop.f32.mrb[1].mxu0  ;;  %v786_v13 = vpop.f32.mrb[1].mxu1 }
 0x165   : > { %v766_v14 = vadd.f32 %v765_v12, %v764_v10  ;;  %v787_v15 = vadd.f32 %v786_v13, %v785_v11 }
 0x167   : > { %v767_v17 = vpop.f32.mrb[2].mxu0  ;;  %v788_v18 = vpop.f32.mrb[2].mxu1  ;;  %v542_v21 = vadd.f32 %v766_v14, %v719_v16  ;;  %v549_v22 = vadd.f32 %v787_v15, %v719_v16 }
 0x168   : > { %v768_v19 = vpop.f32.mrb[3].mxu0  ;;  %v789_v20 = vpop.f32.mrb[3].mxu1 }
 0x169   : > { %v769_v23 = vadd.f32 %v768_v19, %v767_v17  ;;  %v790_v24 = vadd.f32 %v789_v20, %v788_v18  ;;  %555 = vst [vmem:[%s1292_s5] sm:$0xff] %v542_v21  ;;  %562 = vst [vmem:[%s1292_s5 + $0x38] sm:$0xff] %v549_v22 }
 0x16b   : > { %v770_v25 = vpop.f32.mrb[4].mxu0  ;;  %v791_v26 = vpop.f32.mrb[4].mxu1  ;;  %v543_v29 = vadd.f32 %v769_v23, %v719_v16  ;;  %v550_v30 = vadd.f32 %v790_v24, %v719_v16 }
 0x16c   : > { %v771_v27 = vpop.f32.mrb[5].mxu0  ;;  %v792_v28 = vpop.f32.mrb[5].mxu1 }
 0x16d   : > { %v772_v31 = vadd.f32 %v771_v27, %v770_v25  ;;  %v793_v32 = vadd.f32 %v792_v28, %v791_v26  ;;  %556 = vst [vmem:[%s1292_s5 + $0x8] sm:$0xff] %v543_v29  ;;  %563 = vst [vmem:[%s1292_s5 + $0x40] sm:$0xff] %v550_v30 }
 0x16f   : > { %v773_v33 = vpop.f32.mrb[6].mxu0  ;;  %v794_v34 = vpop.f32.mrb[6].mxu1  ;;  %v544_v37 = vadd.f32 %v772_v31, %v719_v16  ;;  %v551_v38 = vadd.f32 %v793_v32, %v719_v16 }
 0x170   : > { %v774_v35 = vpop.f32.mrb[7].mxu0  ;;  %v795_v36 = vpop.f32.mrb[7].mxu1 }
 0x171   : > { %v775_v39 = vadd.f32 %v774_v35, %v773_v33  ;;  %v796_v40 = vadd.f32 %v795_v36, %v794_v34  ;;  %557 = vst [vmem:[%s1292_s5 + $0x10] sm:$0xff] %v544_v37  ;;  %564 = vst [vmem:[%s1292_s5 + $0x48] sm:$0xff] %v551_v38 }
 0x173   : > { %v776_v41 = vpop.f32.mrb[8].mxu0  ;;  %v797_v42 = vpop.f32.mrb[8].mxu1  ;;  %v545_v45 = vadd.f32 %v775_v39, %v719_v16  ;;  %v552_v46 = vadd.f32 %v796_v40, %v719_v16 }
 0x174   : > { %v777_v43 = vpop.f32.mrb[9].mxu0  ;;  %v798_v44 = vpop.f32.mrb[9].mxu1 }
 0x175   : > { %v778_v47 = vadd.f32 %v777_v43, %v776_v41  ;;  %v799_v48 = vadd.f32 %v798_v44, %v797_v42  ;;  %558 = vst [vmem:[%s1292_s5 + $0x18] sm:$0xff] %v545_v45  ;;  %565 = vst [vmem:[%s1292_s5 + $0x50] sm:$0xff] %v552_v46 }
 0x177   : > { %v779_v49 = vpop.f32.mrb[10].mxu0  ;;  %v800_v50 = vpop.f32.mrb[10].mxu1  ;;  %v546_v53 = vadd.f32 %v778_v47, %v719_v16  ;;  %v553_v54 = vadd.f32 %v799_v48, %v719_v16 }
 0x178   : > { %v780_v51 = vpop.f32.mrb[11].mxu0  ;;  %v801_v52 = vpop.f32.mrb[11].mxu1 }
 0x179   : > { %v781_v55 = vadd.f32 %v780_v51, %v779_v49  ;;  %v802_v56 = vadd.f32 %v801_v52, %v800_v50  ;;  %559 = vst [vmem:[%s1292_s5 + $0x20] sm:$0xff] %v546_v53  ;;  %566 = vst [vmem:[%s1292_s5 + $0x58] sm:$0xff] %v553_v54 }
 0x17b   : > { %v782_v57 = vpop.f32.mrb[12].mxu0  ;;  %v547_v59 = vadd.f32 %v781_v55, %v719_v16  ;;  %v554_v60 = vadd.f32 %v802_v56, %v719_v16  ;;  %575 = sbr.rel (!%p1394_p10) target bundleno = 414 (0x19e), region = 52 }
 0x17c   : > { %v783_v58 = vpop.f32.mrb[13].mxu0 }
 0x17d   : > { %v784_v61 = vadd.f32 %v783_v58, %v782_v57  ;;  %560 = vst [vmem:[%s1292_s5 + $0x28] sm:$0xff] %v547_v59  ;;  %567 = vst [vmem:[%s1292_s5 + $0x60] sm:$0xff] %v554_v60 }
 0x17f   : > { %v548_v62 = vadd.f32 %v784_v61, %v719_v16 }
 0x181   : > { %561 = vst [vmem:[%s1292_s5 + $0x30] sm:$0xff] %v548_v62 }
 0x182   : > { %s1406_s30 = smov (!%p578_p12, %s577_s30), 13 }
 0x183   : > { %s1311_s18 = sshll.u32 %s1406_s30, 7 }
 0x184   : > { %s582_s22 = ssub.s32 1664, %s1311_s18 }
 0x185   : > { %583 = vsyncadd %s569_s11, %s582_s22  ;;  %p721_p13 = scmp.ne.s32.totalorder %s1311_s18, 0  ;;  %s730_s26 = smul.u32 1664, %s1061_s15 }
 0x186   : > { %s589_s21 = sshll.u32 %s1292_s5, 4  ;;  %s1077_s10 = smov [#allocation7]   ;;  %s1324_s21 = int_to_ptr.vmem [resolvable:$true] %s589_s21 }
 0x187   : > { %s1322_s7 = scalar_lea.hbm %s1378_s3, %s730_s26  ;;  %s983_s9 = scalar_lea.vmem %s1324_s21, %s1311_s18 }
 0x188   : > { %p984_p1 = scmp.ne.s32.totalorder %s1324_s21, %s983_s9  ;;  %s987_s4 = sshll.u32 %s1077_s10, 4  ;;  %s988_s4 = int_to_ptr.vmem [resolvable:$false] %s987_s4 }
 0x189   : > { %s989_s15 = scalar_lea.vmem %s988_s4, 3328  ;;  %p990_p8 = scmp.lt.s32.totalorder %s1324_s21, %s988_s4 }
 0x18a   : > { %p985_p11 = pnand %p984_p1, %p721_p13  ;;  %p991_p9 = scmp.lt.s32.totalorder %s989_s15, %s983_s9 }
 0x18c   : > { %p986_p4 = pneg %p985_p11  ;;  %p992_p2 = por %p991_p9, %p990_p8 }
 0x18e   : > { %p993_p6 = pnand %p992_p2, %p986_p4 }
 0x190   : > { %996 = shalt.err (!%p993_p6)
}
 0x191   : > { %s997_s23 = scalar_lea.hbm %s1322_s7, %s1311_s18  ;;  %s1001_s5 = scalar_lea.hbm %s1378_s3, 3200 }
 0x192   : > { %p998_p0 = scmp.ne.s32.totalorder %s1322_s7, %s997_s23  ;;  %p1002_p10 = scmp.lt.u32.totalorder %s1322_s7, %s1378_s3 }
 0x193   : > { %p1003_p12 = scmp.lt.u32.totalorder %s1001_s5, %s997_s23  ;;  %p1005_p11 = scmp.lt.u32.totalorder %s997_s23, %s1322_s7 }
 0x194   : > { %p999_p7 = pnand %p998_p0, %p721_p13 }
 0x195   : > { %p1004_p1 = por %p1003_p12, %p1002_p10 }
 0x196   : > { %p1000_p5 = pneg %p999_p7 }
 0x197   : > { %p1006_p4 = por %p1005_p11, %p1004_p1 }
 0x199   : > { %p1007_p8 = pnand %p1006_p4, %p1000_p5 }
 0x19b   : > { %1010 = shalt.err (!%p1007_p8)
}
 0x19c   : > { %s1078_s22 = smov 128   ;;  %s1079_s26 = smov 8  }
 0x19d   : > { %595 = dma.vmem_to_hbm [thread:$0]  (%p721_p13), %s1324_s21, %s1311_s18, %s1322_s7, %s569_s11, %s1078_s22, %s1078_s22, %s1079_s26  }
 0x19e PF: > { %s604_s24 = sand.u32 1, %s1049_s12   ;;  %p1395_p9 = scmp.ne.s32.totalorder %s1387_s28, 0 }
 0x19f   : > { %s605_s6 = scalar_lea.sflag [#allocation4], %s604_s24 }
 0x1a0   : > { %p865_p2 = pnand %p709_p3, %p1395_p9 }
 0x1a2   : > { %1044 = dma.done.wait (!%p865_p2), %s605_s6, 1664  }
 0x1a3   : > { %1046 = vsyncadd (!%p865_p2), %s605_s6, 4294965632  ;;  %s20_s17 = sadd.s32 1, %s1069_s17   ;;  %s1396_s12 = smov %s1053_s13 }
 0x1a4   : > { %p17_p6 = scmp.ge.s32.totalorder %s20_s17, 4   ;;  %s1397_s13 = smov %s1057_s14 }
 0x1a5   : > { %s1398_s14 = smov %s1162_s27  ;;  %s1399_s15 = smov %s1065_s16 }
 0x1a6   : > { %s1400_s16 = smov %s1402_s20  ;;  %19 = sbr.rel (!%p17_p6) target bundleno = 7 (0x7), region = 93 }
 0x1ad   :  { %610 = vsyncpa [#allocation3], 1 }
 0x1ae   :  { %612 = vsyncpa [#allocation3 + $0x1], 1 }
 0x1af   :  { %613 = vsyncpa [#allocation6], 1 }
 0x1b0   :  { %614 = vsyncpa [#allocation4], 1 }
 0x1b1   :  { %616 = vsyncpa [#allocation4 + $0x1], 1 }

</bundles_post_ra>
